<compile_context>
chip_gen: v6e
topology: v6e:2x2x1
jax: 0.10.0
libtpu: 0.0.40
codegen_flags: <defaults>
</compile_context>

<pallas_src>
import functools
import math

import jax
import jax.numpy as jnp
from jax.experimental import pallas as pl
from jax.experimental.pallas import tpu as pltpu


_LANE = 128          # lane width; every layer width is padded to this
_SUBLANE = 8
_NEG_BIG = -1e30     # bias for padded logit lanes of the final layer
_NUM_ACTIONS = 4


# ----------------------------------------------------------------------------
# Kernel
# ----------------------------------------------------------------------------
def _mlp_softmax_kernel(x_ref, w_ref, b_ref, o_ref, *,
                        num_layers, relu_flags, d_in):
    """One batch tile of the full MLP + 4-way softmax.

    x_ref: (TB, d_in) bf16     unpadded states (d_in = sublane-rounded input)
    w_ref: (L, 128, 128) bf16  packed zero-padded weights (resident)
    b_ref: (L, 1, 128)  f32    packed biases; final layer pad lanes = -1e30
    o_ref: (4, TB)      f32    transposed probabilities (lane-dense writeback)
    """
    # First layer: contract only over the real d_in input features.
    w0 = w_ref[0, :d_in, :]                                   # (d_in, 128) bf16
    h = jnp.dot(x_ref[...], w0, preferred_element_type=jnp.float32)
    h = h + b_ref[0]
    if relu_flags[0]:
        h = jnp.maximum(h, 0.0)

    for li in range(1, num_layers):
        acc = jnp.dot(h.astype(jnp.bfloat16), w_ref[li],
                      preferred_element_type=jnp.float32)     # MXU, f32 acc
        h = acc + b_ref[li]
        if relu_flags[li]:
            h = jnp.maximum(h, 0.0)

    # Softmax over the 128 lanes.  Padded logit lanes sit at ~-1e30, so their
    # exp underflows to exactly 0 and the result equals the 4-way softmax.
    m = jnp.max(h, axis=-1, keepdims=True)
    e = jnp.exp(h - m)
    s = jnp.sum(e, axis=-1, keepdims=True)
    p = e / s                                                 # exact normalization

    # Batch -> lane axis; only the 4 real probability rows are written back.
    p_t = p.T                                                 # (128, TB)
    o_ref[...] = p_t[:_NUM_ACTIONS, :]


# ----------------------------------------------------------------------------
# Parameter init (PyTorch nn.Linear-style) and packing
# ----------------------------------------------------------------------------
def init_params(key, input_size, hidden_layers):
    """Weights as (in, out) f32, biases as (1, out) f32, incl. final Linear(*, 4)."""
    layer_sizes = [input_size] + list(hidden_layers)
    dims = [(layer_sizes[i], layer_sizes[i + 1]) for i in range(len(layer_sizes) - 1)]
    dims.append((layer_sizes[-1], _NUM_ACTIONS))

    weights, biases = [], []
    for fan_in, fan_out in dims:
        key, kw, kb = jax.random.split(key, 3)
        bound = 1.0 / math.sqrt(fan_in)
        weights.append(jax.random.uniform(kw, (fan_in, fan_out), jnp.float32,
                                          minval=-bound, maxval=bound))
        biases.append(jax.random.uniform(kb, (1, fan_out), jnp.float32,
                                         minval=-bound, maxval=bound))
    return weights, biases


def pack_params(weights, biases, pad=_LANE):
    """Pack all layers into one (L, pad, pad) bf16 weight slab and one
    (L, 1, pad) f32 bias slab, zero-padded to 128 lanes/sublanes.

    The final layer's padded bias lanes are set to -1e30 so the in-kernel
    softmax over all 128 lanes equals the softmax over the real 4 logits.
    """
    L = len(weights)
    for w in weights:
        if w.shape[0] > pad or w.shape[1] > pad:
            # TODO(synk): layers wider than 128 would need K/N tiling of the
            # packed slab; not required for this module's default sizes.
            raise ValueError(f"layer dims {w.shape} exceed packing width {pad}")

    w_slabs, b_slabs = [], []
    for li, (w, b) in enumerate(zip(weights, biases)):
        fin, fout = w.shape
        w_pad = jnp.zeros((pad, pad), jnp.float32).at[:fin, :fout].set(w)
        fill = _NEG_BIG if li == L - 1 else 0.0
        b_pad = jnp.full((1, pad), fill, jnp.float32).at[:, :fout].set(
            b.reshape(1, fout))
        w_slabs.append(w_pad.astype(jnp.bfloat16))
        b_slabs.append(b_pad)                                   # stays f32
    return jnp.stack(w_slabs), jnp.stack(b_slabs)   # (L,128,128) bf16, (L,1,128) f32


# ----------------------------------------------------------------------------
# Forward wrappers
# ----------------------------------------------------------------------------
def linear_2048_qnet_forward_batched(states, w_packed, b_packed, relu_flags,
                                     *, tile_b=512):
    """Batched forward.  states: (B, input_size).  Returns (B, 4) f32 (each row
    is the module applied to that 1-D state, softmax over 4 logits).

    tile_b: batch rows per grid step (multiple of 128).  This kernel is
    HBM/overhead-bound, so bigger is better (512-2048); on v7x cap it at
    ~B/4 so the "parallel" batch axis still splits across both TensorCores.
    On v5e keep tile_b <= 2048 to stay inside the 16 MiB scoped-VMEM default.
    """
    L = int(w_packed.shape[0])
    if len(relu_flags) != L:
        raise ValueError("relu_flags length must equal number of Linear layers")
    if tile_b % _LANE != 0:
        raise ValueError("tile_b must be a multiple of 128")
    pad = int(w_packed.shape[-1])

    B, D = states.shape
    if D > pad:
        raise ValueError(f"input_size {D} exceeds packing width {pad}")

    d_in = ((D + _SUBLANE - 1) // _SUBLANE) * _SUBLANE          # sublane-align K
    b_pad = pl.cdiv(B, tile_b) * tile_b

    x = states.astype(jnp.bfloat16)
    if b_pad != B or d_in != D:
        x = jnp.pad(x, ((0, b_pad - B), (0, d_in - D)))         # remainder only

    kernel = functools.partial(
        _mlp_softmax_kernel, num_layers=L,
        relu_flags=tuple(bool(f) for f in relu_flags), d_in=d_in)

    out_t = pl.pallas_call(
        kernel,
        out_shape=jax.ShapeDtypeStruct((_NUM_ACTIONS, b_pad), jnp.float32),
        grid=(b_pad // tile_b,),
        in_specs=[
            pl.BlockSpec((tile_b, d_in), lambda i: (i, 0)),      # states tile (bf16)
            pl.BlockSpec((L, pad, pad), lambda i: (0, 0, 0)),    # weights (resident)
            pl.BlockSpec((L, 1, pad), lambda i: (0, 0, 0)),      # biases  (resident)
        ],
        out_specs=pl.BlockSpec((_NUM_ACTIONS, tile_b), lambda i: (0, i)),
        compiler_params=pltpu.CompilerParams(
            dimension_semantics=("parallel",)),                  # v7x: 2 TCs
    )(x, w_packed, b_packed)

    return out_t[:, :B].T                                        # (B, 4)


def linear_2048_qnet_forward(state, w_packed, b_packed, relu_flags):
    """Single-state forward matching the PyTorch module's intended usage:
    state (input_size,) -> softmax'd (4,) action distribution."""
    out = linear_2048_qnet_forward_batched(state.reshape(1, -1),
                                           w_packed, b_packed, relu_flags,
                                           tile_b=_LANE)
    return out[0]


def reference_forward(states, weights, biases, relu_flags):
    """Pure-JAX f32 reference.  Each row is an independent 1-D state, so the
    module's Softmax(dim=0) over its (4,) output == per-row softmax here."""
    h = states.astype(jnp.float32)
    for li in range(len(weights)):
        h = h @ weights[li] + biases[li]
        if relu_flags[li]:
            h = jnp.maximum(h, 0.0)
    return jax.nn.softmax(h, axis=-1)


# ----------------------------------------------------------------------------
# Demo / self-check
# ----------------------------------------------------------------------------
if __name__ == "__main__":
    input_size = 32
    hidden_layers = [64, 64]
    batch = 256
    tile_b = 128     # small demo shapes; production default is 512+

    # ReLU flags follow the PyTorch loop: ReLU after linear i only for i > 0,
    # and NO ReLU after the final Linear(*, 4).
    num_hidden_linears = len([input_size] + hidden_layers) - 1
    relu_flags = [i > 0 for i in range(num_hidden_linears)] + [False]

    key = jax.random.PRNGKey(0)
    key, k_state = jax.random.split(key)
    states = jax.random.uniform(k_state, (batch, input_size), jnp.float32,
                                minval=0.0, maxval=11.0)

    weights, biases = init_params(key, input_size, hidden_layers)
    w_packed, b_packed = pack_params(weights, biases)

    out = linear_2048_qnet_forward_batched(states, w_packed, b_packed,
                                           relu_flags, tile_b=tile_b)
    out = jax.block_until_ready(out)

    ref = reference_forward(states, weights, biases, relu_flags)

    assert out.shape == (batch, _NUM_ACTIONS), out.shape
    # bf16 inputs/weights/activations vs f32 reference -> loosened tolerance.
    assert jnp.allclose(out, ref, atol=3e-2, rtol=3e-2), (
        float(jnp.max(jnp.abs(out - ref))))
    # Exact softmax normalization (no approx reciprocal): rows sum to 1.
    assert jnp.allclose(jnp.sum(out, axis=-1), 1.0, atol=1e-3)

    # Single-state path (module's intended 1-D usage) agrees with the batch.
    single = linear_2048_qnet_forward(states[0], w_packed, b_packed, relu_flags)
    single = jax.block_until_ready(single)
    assert single.shape == (_NUM_ACTIONS,)
    assert jnp.allclose(single, ref[0], atol=3e-2, rtol=3e-2)

    print("KERNEL_OK")
</pallas_src>

<mosaic_0001>
module attributes {stable_mosaic.version = 11 : i64} {
  func.func @_mlp_softmax_kernel(%arg0: i32, %arg1: memref<128x32xbf16, #tpu.memory_space<vmem>>, %arg2: memref<3x128x128xbf16, #tpu.memory_space<vmem>>, %arg3: memref<3x1x128xf32, #tpu.memory_space<vmem>>, %arg4: memref<4x128xf32, #tpu.memory_space<vmem>>) attributes {dimension_semantics = [#tpu.dimension_semantics<parallel>], iteration_bounds = array<i64: 2>, scalar_prefetch = 0 : i64, scratch_operands = 0 : i64, tpu.core_type = #tpu.core_type<tc>, window_params = [{transform_indices = @transform_0, window_bounds = array<i64: 128, 32>}, {pipeline_mode = #tpu.pipeline_mode<synchronous>, transform_indices = @transform_1, window_bounds = array<i64: 3, 128, 128>}, {pipeline_mode = #tpu.pipeline_mode<synchronous>, transform_indices = @transform_2, window_bounds = array<i64: 3, 1, 128>}, {transform_indices = @transform_3, window_bounds = array<i64: 4, 128>}]} {
    %c0 = arith.constant 0 : index
    %c0_0 = arith.constant 0 : index
    %c0_1 = arith.constant 0 : index
    %0 = vector.load %arg2[%c0, %c0_0, %c0_1] : memref<3x128x128xbf16, #tpu.memory_space<vmem>>, vector<1x32x128xbf16>
    %1 = vector.shape_cast %0 : vector<1x32x128xbf16> to vector<32x128xbf16>
    %c0_2 = arith.constant 0 : index
    %c0_3 = arith.constant 0 : index
    %2 = vector.load %arg1[%c0_2, %c0_3] : memref<128x32xbf16, #tpu.memory_space<vmem>>, vector<128x32xbf16>
    %cst = arith.constant dense<0.000000e+00> : vector<128x128xf32>
    %3 = tpu.matmul %2, %1, %cst {dimension_numbers = #tpu.dot_dimension_numbers<[1], [0], [0], [1], [0, 0, 1, 1], [], []>} : vector<128x32xbf16>, vector<32x128xbf16>, vector<128x128xf32> -> vector<128x128xf32>
    %c0_4 = arith.constant 0 : index
    %c0_5 = arith.constant 0 : index
    %c0_6 = arith.constant 0 : index
    %4 = vector.load %arg3[%c0_4, %c0_5, %c0_6] : memref<3x1x128xf32, #tpu.memory_space<vmem>>, vector<1x1x128xf32>
    %5 = vector.shape_cast %4 : vector<1x1x128xf32> to vector<1x128xf32>
    %6 = vector.broadcast %5 : vector<1x128xf32> to vector<128x128xf32>
    %7 = arith.addf %3, %6 : vector<128x128xf32>
    %8 = arith.truncf %7 : vector<128x128xf32> to vector<128x128xbf16>
    %c1 = arith.constant 1 : index
    %c0_7 = arith.constant 0 : index
    %c0_8 = arith.constant 0 : index
    %9 = vector.load %arg2[%c1, %c0_7, %c0_8] : memref<3x128x128xbf16, #tpu.memory_space<vmem>>, vector<1x128x128xbf16>
    %10 = vector.shape_cast %9 : vector<1x128x128xbf16> to vector<128x128xbf16>
    %cst_9 = arith.constant dense<0.000000e+00> : vector<128x128xf32>
    %11 = tpu.matmul %8, %10, %cst_9 {dimension_numbers = #tpu.dot_dimension_numbers<[1], [0], [0], [1], [0, 0, 1, 1], [], []>} : vector<128x128xbf16>, vector<128x128xbf16>, vector<128x128xf32> -> vector<128x128xf32>
    %c1_10 = arith.constant 1 : index
    %c0_11 = arith.constant 0 : index
    %c0_12 = arith.constant 0 : index
    %12 = vector.load %arg3[%c1_10, %c0_11, %c0_12] : memref<3x1x128xf32, #tpu.memory_space<vmem>>, vector<1x1x128xf32>
    %13 = vector.shape_cast %12 : vector<1x1x128xf32> to vector<1x128xf32>
    %14 = vector.broadcast %13 : vector<1x128xf32> to vector<128x128xf32>
    %15 = arith.addf %11, %14 : vector<128x128xf32>
    %cst_13 = arith.constant 0.000000e+00 : f32
    %16 = vector.broadcast %cst_13 : f32 to vector<128x128xf32>
    %17 = arith.maximumf %15, %16 : vector<128x128xf32>
    %18 = arith.truncf %17 : vector<128x128xf32> to vector<128x128xbf16>
    %c2 = arith.constant 2 : index
    %c0_14 = arith.constant 0 : index
    %c0_15 = arith.constant 0 : index
    %19 = vector.load %arg2[%c2, %c0_14, %c0_15] : memref<3x128x128xbf16, #tpu.memory_space<vmem>>, vector<1x128x128xbf16>
    %20 = vector.shape_cast %19 : vector<1x128x128xbf16> to vector<128x128xbf16>
    %cst_16 = arith.constant dense<0.000000e+00> : vector<128x128xf32>
    %21 = tpu.matmul %18, %20, %cst_16 {dimension_numbers = #tpu.dot_dimension_numbers<[1], [0], [0], [1], [0, 0, 1, 1], [], []>} : vector<128x128xbf16>, vector<128x128xbf16>, vector<128x128xf32> -> vector<128x128xf32>
    %c2_17 = arith.constant 2 : index
    %c0_18 = arith.constant 0 : index
    %c0_19 = arith.constant 0 : index
    %22 = vector.load %arg3[%c2_17, %c0_18, %c0_19] : memref<3x1x128xf32, #tpu.memory_space<vmem>>, vector<1x1x128xf32>
    %23 = vector.shape_cast %22 : vector<1x1x128xf32> to vector<1x128xf32>
    %24 = vector.broadcast %23 : vector<1x128xf32> to vector<128x128xf32>
    %25 = arith.addf %21, %24 : vector<128x128xf32>
    %cst_20 = arith.constant dense<0xFF800000> : vector<128xf32>
    %26 = vector.multi_reduction <maximumf>, %25, %cst_20 [1] : vector<128x128xf32> to vector<128xf32>
    %27 = vector.shape_cast %26 : vector<128xf32> to vector<128x1xf32>
    %28 = vector.broadcast %27 : vector<128x1xf32> to vector<128x128xf32>
    %29 = arith.subf %25, %28 : vector<128x128xf32>
    %30 = math.exp %29 : vector<128x128xf32>
    %cst_21 = arith.constant dense<0.000000e+00> : vector<128xf32>
    %31 = vector.multi_reduction <add>, %30, %cst_21 [1] : vector<128x128xf32> to vector<128xf32>
    %32 = vector.shape_cast %31 : vector<128xf32> to vector<128x1xf32>
    %33 = vector.broadcast %32 : vector<128x1xf32> to vector<128x128xf32>
    %34 = arith.divf %30, %33 : vector<128x128xf32>
    %35 = tpu.transpose %34, [1, 0] : vector<128x128xf32> -> vector<128x128xf32>
    %36 = vector.extract_strided_slice %35 {offsets = [0, 0], sizes = [4, 128], strides = [1, 1]} : vector<128x128xf32> to vector<4x128xf32>
    %c0_22 = arith.constant 0 : index
    %c0_23 = arith.constant 0 : index
    %37 = vector.load %arg4[%c0_22, %c0_23] : memref<4x128xf32, #tpu.memory_space<vmem>>, vector<4x128xf32>
    tpu.vector_store %arg4[%c0_22, %c0_23], %36 {strides = array<i32>} : memref<4x128xf32, #tpu.memory_space<vmem>>, vector<4x128xf32>,
    return
  }
  func.func @transform_0(%arg0: i32) -> (i32, i32) {
    %c0_i32 = arith.constant 0 : i32
    %c0_i32_0 = arith.constant 0 : i32
    return %arg0, %c0_i32 : i32, i32
  }
  func.func @transform_1(%arg0: i32) -> (i32, i32, i32) {
    %c0_i32 = arith.constant 0 : i32
    %c0_i32_0 = arith.constant 0 : i32
    %c0_i32_1 = arith.constant 0 : i32
    %c0_i32_2 = arith.constant 0 : i32
    return %c0_i32, %c0_i32_0, %c0_i32_1 : i32, i32, i32
  }
  func.func @transform_2(%arg0: i32) -> (i32, i32, i32) {
    %c0_i32 = arith.constant 0 : i32
    %c0_i32_0 = arith.constant 0 : i32
    %c0_i32_1 = arith.constant 0 : i32
    %c0_i32_2 = arith.constant 0 : i32
    return %c0_i32, %c0_i32_0, %c0_i32_1 : i32, i32, i32
  }
  func.func @transform_3(%arg0: i32) -> (i32, i32) {
    %c0_i32 = arith.constant 0 : i32
    %c0_i32_0 = arith.constant 0 : i32
    return %c0_i32, %arg0 : i32, i32
  }
}

</mosaic_0001>

<bundles_post_ra>
// kernel: tpu_custom_call.1
= control target key start
LH: loop header
LB: loop body
LE: loop exit
PB: predicated region body
PF: predicated region fallthrough
CT: control target
= control target key end

     0   :  { %8 = vsyncpa [#allocation3], 0  ;;  %s1683_s0 = inlined_call_operand.vmem [shape: bf16[256,32], index: 0, kind: input, shape index: {}]   ;;  %s1684_s1 = inlined_call_operand.hbm [shape: bf16[3,128,128], index: 1, kind: input, shape index: {}]   ;;  %s1685_s2 = inlined_call_operand.vmem [shape: f32[3,1,128], index: 2, kind: input, shape index: {}]   ;;  %s1686_s3 = inlined_call_operand.hbm [shape: f32[4,256], index: 3, kind: output, shape index: {}]  }
   0x1   :  { %9 = vsyncpa [#allocation4], 0 }
   0x2   :  { %11 = vsyncpa [#allocation4 + $0x1], 0  ;;  %s1458_s12 = smov 0   ;;  %s1460_s13 = smov 0  }
   0x3   :  { %s1462_s14 = smov 0   ;;  %s1464_s15 = smov 0  }
   0x4 LB: > { %s1479_s16 = sadd.s32 4294967295, %s1432_s15   ;;  %s1022_s17 = sadd.s32 4294967294, %s1432_s15   ;;  %s1432_s15 = sphi %s1464_s15, %s1694_s15   ;;  %s1428_s14 = sphi %s1462_s14, %s1693_s14   ;;  %s1424_s13 = sphi %s1460_s13, %s1692_s13   ;;  %s1420_s12 = sphi %s1458_s12, %s1691_s12  }
   0x5   : > { %s1483_s18 = sadd.s32 1, %s1432_s15   ;;  %s92_s19 = sadd.s32 1, %s1428_s14 }
   0x6   : > { %s89_s20 = ssub.s32 %s1432_s15, %s1483_s18  ;;  %p102_p0 = scmp.ne.s32.totalorder %s1428_s14, %s1424_s13 }
   0x7   : > { %p90_p1 = scmp.eq.s32.totalorder %s89_s20, 0  ;;  %p103_p2 = scmp.eq.s32.totalorder %s1479_s16, 1 }
   0x8   : > { %p108_p3 = scmp.ne.s32.totalorder %s1424_s13, %s1420_s12  ;;  %p109_p4 = scmp.eq.s32.totalorder %s1022_s17, 1 }
   0x9   : > { %s1494_s21 = scalar_select %p90_p1, %s1428_s14, %s92_s19  }
   0xa   : > { %p1496_p5 = por %p103_p2, %p102_p0  ;;  %p1500_p6 = por %p109_p4, %p108_p3 }
   0xb   : > { %p1023_p7 = scmp.ge.s32.totalorder %s1432_s15, 1  ;;  %p116_p8 = scmp.lt.s32.totalorder %s1432_s15, 3 }
   0xc   : > { %s1688_s23 = scalar_select %p1500_p6, 1, 0 }
   0xd   : > { %p1214_p9 = scmp.eq.s32.totalorder %s1479_s16, 0  ;;  %p1507_p10 = pnand %p1023_p7, %p116_p8 }
   0xe   : > { %s1434_s25 = smov [#allocation2]  }
   0xf   : > { %s128_s26 = sshll.u32 %s1434_s25, 4  ;;  %p1206_p11 = pneg %p1507_p10  ;;  %s129_s26 = int_to_ptr.vmem [resolvable:$true] %s128_s26 }
  0x10   : > { %s1353_s27 = scalar_lea.vmem %s129_s26, 3072  ;;  %p1361_p3 = scmp.lt.s32.totalorder %s129_s26, %s129_s26 }
  0x11   : > { %p1207_p12 = pnand %p1214_p9, %p1206_p11  ;;  %p1354_p0 = scmp.ne.s32.totalorder %s129_s26, %s1353_s27 }
  0x12   : > { %p1362_p4 = scmp.lt.s32.totalorder %s1353_s27, %s1353_s27 }
  0x13   : > { %p1344_p13 = pneg %p1207_p12 }
  0x14   : > { %p1363_p6 = por %p1362_p4, %p1361_p3 }
  0x15   : > { %p1356_p1 = pnand %p1354_p0, %p1344_p13 }
  0x17   : > { %p1357_p2 = pneg %p1356_p1 }
  0x19   : > { %p1364_p7 = pnand %p1363_p6, %p1357_p2 }
  0x1b   : > { %1367 = shalt.err (!%p1364_p7)
}
  0x1c   : > { %s1435_s28 = smov 64   ;;  %s1436_s29 = smov 4  }
  0x1d   : > { %1209 = dma.hbm_to_vmem [thread:$0]  (!%p1207_p12), %s1684_s1, 3072, %s129_s26, [#allocation3], %s1435_s28, %s1435_s28, %s1436_s29  }
  0x1e   : > { %156 = sbr.rel (%p1507_p10) target bundleno = 1102 (0x44e), region = 32 }
  0x23   : > { %1411 = dma.done.wait (%p1214_p9), [#allocation3], 3072  }
  0x24   : > { %1413 = vsyncadd (%p1214_p9), [#allocation3], 4294964224  ;;  %s1029_s5 = sshll.u32 %s1479_s16, 4  ;;  %v1252_v0 = vld [vmem:[#allocation2 + $0x8] sm:$0xff]   ;;  %v1253_v1 = vld [vmem:[#allocation2] sm:$0xff]   ;;  %vm266_vm0 = vcmask 261120  }
  0x25   : > { %p181_p8 = scmp.lt.s32.totalorder %s1029_s5, 31  ;;  %1116 = vmatprep.subr.bf16.mxu0 %v1252_v0  ;;  %v1262_v5 = vld [vmem:[#allocation2 + $0x78] sm:$0xff]   ;;  %v1263_v6 = vld [vmem:[#allocation2 + $0x70] sm:$0xff]   ;;  %v1264_v9 = vld [vmem:[#allocation2 + $0x68] sm:$0xff]   ;;  %s177_s25 = sand.u32 1, %s1424_s13  }
  0x26   : > { %1117 = vmatpush3.bf16.msra.mxu0 %v1252_v0  ;;  %1136 = vmatprep.subr.bf16.mxu1 %v1262_v5  ;;  %v1265_v10 = vld [vmem:[#allocation2 + $0x60] sm:$0xff]   ;;  %v1266_v12 = vld [vmem:[#allocation2 + $0x58] sm:$0xff]   ;;  %v1267_v15 = vld [vmem:[#allocation2 + $0x50] sm:$0xff]   ;;  %s1028_s26 = sshll.u32 %s177_s25, 2  ;;  %s1071_s29 = sshll.u32 %s1479_s16, 6 }
  0x27   : > { %s1696_s5 = smov (!%p181_p8, %s1029_s5), 31  ;;  %1118 = vmatprep.subr.bf16.mxu0 %v1253_v1  ;;  %1137 = vmatpush3.bf16.msra.mxu1 %v1262_v5  ;;  %v1268_v16 = vld [vmem:[#allocation2 + $0x48] sm:$0xff]   ;;  %v1269_v17 = vld [vmem:[#allocation2 + $0x40] sm:$0xff]   ;;  %v1270_v18 = vld [vmem:[#allocation2 + $0xb8] sm:$0xff]   ;;  %s179_s27 = scalar_lea.vmem [#allocation5], %s1028_s26 }
  0x28   : > { %s1030_s6 = sshll.u32 %s1696_s5, 2  ;;  %1138 = vmatprep.subr.bf16.mxu1 %v1263_v6  ;;  %v1271_v19 = vld [vmem:[#allocation2 + $0xb0] sm:$0xff]   ;;  %v1272_v20 = vld [vmem:[#allocation2 + $0xa8] sm:$0xff]   ;;  %v1273_v21 = vld [vmem:[#allocation2 + $0xa0] sm:$0xff]   ;;  %s951_s28 = sshll.u32 %s179_s27, 4  ;;  %s1645_s28 = int_to_ptr.vmem [resolvable:$true] %s951_s28 }
  0x29   : > { %s1528_s9 = scalar_lea.vmem %s1683_s0, %s1030_s6  ;;  %v1274_v22 = vld [vmem:[#allocation2 + $0x98] sm:$0xff]   ;;  %v1031_v26 = vld [vmem:[%s1685_s2] ss:$0 sm:$0xff]  ;;  %v1275_v0 = vld [vmem:[#allocation2 + $0x90] sm:$0xff]   ;;  %s949_s5 = scalar_lea.hbm %s1686_s3, %s1071_s29 }
  0x2a   : > { %v1254_v2 = vld [vmem:[%s1528_s9] sm:$0xff]   ;;  %v1255_v3 = vld [vmem:[%s1528_s9 + $0x8] sm:$0xff]   ;;  %1119 = vmatpush3.bf16.msra.mxu0 %v1253_v1  ;;  %v1256_v4 = vld [vmem:[%s1528_s9 + $0x10] sm:$0xff]   ;;  %s938_s6 = scalar_lea.sflag [#allocation4], %s177_s25  ;;  %s1368_s7 = scalar_lea.vmem %s1645_s28, 64 }
  0x2b   : > { %1120 = vmatprep.mubr.msk.bf16.mxu0 %vm266_vm0, %v1254_v2  ;;  %v1257_v7 = vld [vmem:[%s1528_s9 + $0x18] sm:$0xff]   ;;  %v1258_v8 = vld [vmem:[%s1528_s9 + $0x20] sm:$0xff]   ;;  %1139 = vmatpush3.bf16.msra.mxu1 %v1263_v6  ;;  %v1259_v11 = vld [vmem:[%s1528_s9 + $0x28] sm:$0xff]   ;;  %p1369_p6 = scmp.ne.s32.totalorder %s1645_s28, %s1368_s7  ;;  %s1437_s8 = smov [#allocation5]  }
  0x2c   : > { %1140 = vmatprep.subr.bf16.mxu1 %v1264_v9  ;;  %v1260_v13 = vld [vmem:[%s1528_s9 + $0x30] sm:$0xff]   ;;  %v1261_v14 = vld [vmem:[%s1528_s9 + $0x38] sm:$0xff]   ;;  %1168 = vmatprep.subr.bf16.mxu0 %v1270_v18  ;;  %v1276_v1 = vld [vmem:[#allocation2 + $0x88] sm:$0xff]   ;;  %s1372_s9 = sshll.u32 %s1437_s8, 4  ;;  %s1373_s9 = int_to_ptr.vmem [resolvable:$false] %s1372_s9 }
  0x2d   : > { %1121 = vmatmul.mubr.msk.bf16.vlgmr.msra.gmra.mxu0 %vm266_vm0, %v1255_v3  ;;  %v1277_v2 = vld [vmem:[#allocation2 + $0x80] sm:$0xff]   ;;  %p1370_p9 = pnand %p1369_p6, %p1496_p5  ;;  %s1374_s16 = scalar_lea.vmem %s1373_s9, 128 }
  0x2e   : > { %1124 = vmatprep.mubr.msk.bf16.mxu0 %vm266_vm0, %v1256_v4  ;;  %1169 = vmatpush3.bf16.msra.mxu0 %v1270_v18  ;;  %v1051_v5 = vld [vmem:[%s1685_s2 + $0x1] ss:$0 sm:$0xff]  ;;  %p1375_p11 = scmp.lt.s32.totalorder %s1645_s28, %s1373_s9  ;;  %p1376_p12 = scmp.lt.s32.totalorder %s1374_s16, %s1368_s7 }
  0x2f   : > { %1141 = vmatpush3.bf16.msra.mxu1 %v1264_v9  ;;  %1170 = vmatprep.subr.bf16.mxu0 %v1271_v19  ;;  %p1371_p10 = pneg %p1370_p9 }
  0x30   : > { %1142 = vmatprep.subr.bf16.mxu1 %v1265_v10  ;;  %p1377_p13 = por %p1376_p12, %p1375_p11 }
  0x32   : > { %1171 = vmatpush3.bf16.msra.mxu0 %v1271_v19  ;;  %p1378_p0 = pnand %p1377_p13, %p1371_p10 }
  0x33   : > { %1143 = vmatpush3.bf16.msra.mxu1 %v1265_v10  ;;  %1172 = vmatprep.subr.bf16.mxu0 %v1272_v20 }
  0x34   : > { %1144 = vmatprep.subr.bf16.mxu1 %v1266_v12 }
  0x35   : > { %1125 = vmatmul.mubr.msk.bf16.gmra.mxu0 %vm266_vm0, %v1257_v7 }
  0x36   : > { %1128 = vmatprep.mubr.msk.bf16.mxu0 %vm266_vm0, %v1258_v8  ;;  %1173 = vmatpush3.bf16.msra.mxu0 %v1272_v20 }
  0x37   : > { %1145 = vmatpush3.bf16.msra.mxu1 %v1266_v12  ;;  %1174 = vmatprep.subr.bf16.mxu0 %v1273_v21 }
  0x38   : > { %1146 = vmatprep.subr.bf16.mxu1 %v1267_v15 }
  0x3a   : > { %1175 = vmatpush3.bf16.msra.mxu0 %v1273_v21 }
  0x3b   : > { %1147 = vmatpush3.bf16.msra.mxu1 %v1267_v15  ;;  %1176 = vmatprep.subr.bf16.mxu0 %v1274_v22 }
  0x3c   : > { %1148 = vmatprep.subr.bf16.mxu1 %v1268_v16 }
  0x3d   : > { %1129 = vmatmul.mubr.msk.bf16.gmra.mxu0 %vm266_vm0, %v1259_v11 }
  0x3e   : > { %1132 = vmatprep.mubr.msk.bf16.mxu0 %vm266_vm0, %v1260_v13  ;;  %1177 = vmatpush3.bf16.msra.mxu0 %v1274_v22 }
  0x3f   : > { %1149 = vmatpush3.bf16.msra.mxu1 %v1268_v16  ;;  %1178 = vmatprep.subr.bf16.mxu0 %v1275_v0 }
  0x40   : > { %1150 = vmatprep.subr.bf16.mxu1 %v1269_v17 }
  0x42   : > { %1179 = vmatpush3.bf16.msra.mxu0 %v1275_v0 }
  0x43   : > { %1151 = vmatpush3.bf16.msra.mxu1 %v1269_v17  ;;  %1180 = vmatprep.subr.bf16.mxu0 %v1276_v1 }
  0x45   : > { %1133 = vmatmul.mubr.msk.bf16.gmra.mxu0 %vm266_vm0, %v1261_v14 }
  0x46   : > { %1181 = vmatpush3.bf16.msra.mxu0 %v1276_v1 }
  0x47   : > { %1182 = vmatprep.subr.bf16.mxu0 %v1277_v2 }
  0x4a   : > { %1183 = vmatpush3.bf16.msra.mxu0 %v1277_v2 }
  0xed   : > { %v1122_v23 = vpop.f32.mrf.mxu0 }
  0xee   : > { %v334_v31 = vadd.f32 %v1122_v23, %v1031_v26 }
  0xef   : > { %v325_v24 = vpop.f32.mrf.mxu0 }
  0xf0   : > { %v326_v29 = vadd.f32 %v1031_v26, %v325_v24 }
  0xf1   : > { %v1123_v25 = vpop.f32.mrf.mxu0 }
  0xf2   : > { %v337_v27 = vadd.f32 %v1123_v25, %v1031_v26 }
  0xf3   : > { %v328_v28 = vpop.f32.mrf.mxu0 }
  0xf4   : > { %v329_v30 = vadd.f32 %v1031_v26, %v328_v28  ;;  %v389_v34 = vpack.c.bf16 %v337_v27, %v334_v31 }
  0xf5   : > { %v1126_v32 = vpop.f32.mrf.mxu0 }
  0xf6   : > { %v388_v33 = vpack.c.bf16 %v329_v30, %v326_v29  ;;  %v350_v41 = vadd.f32 %v1126_v32, %v1031_v26 }
  0xf7   : > { %v341_v35 = vpop.f32.mrf.mxu0 }
  0xf8   : > { %1152 = vmatprep.mubr.bf16.mxu1 %v388_v33  ;;  %v342_v39 = vadd.f32 %v1031_v26, %v341_v35 }
  0xf9   : > { %v1127_v36 = vpop.f32.mrf.mxu0  ;;  %1153 = vmatmul.mubr.bf16.vlgmr.msra.gmra.mxu1 %v389_v34 }
  0xfa   : > { %v353_v37 = vadd.f32 %v1127_v36, %v1031_v26 }
  0xfb   : > { %v344_v38 = vpop.f32.mrf.mxu0 }
  0xfc   : > { %v345_v40 = vadd.f32 %v1031_v26, %v344_v38  ;;  %v391_v44 = vpack.c.bf16 %v353_v37, %v350_v41 }
  0xfd   : > { %v1130_v42 = vpop.f32.mrf.mxu0 }
  0xfe   : > { %v390_v43 = vpack.c.bf16 %v345_v40, %v342_v39  ;;  %v366_v46 = vadd.f32 %v1130_v42, %v1031_v26 }
  0xff   : > { %v357_v45 = vpop.f32.mrf.mxu0 }
 0x100   : > { %1156 = vmatprep.mubr.bf16.mxu1 %v390_v43  ;;  %v358_v48 = vadd.f32 %v1031_v26, %v357_v45 }
 0x101   : > { %v1131_v47 = vpop.f32.mrf.mxu0  ;;  %1157 = vmatmul.mubr.bf16.gmra.mxu1 %v391_v44 }
 0x102   : > { %v369_v49 = vadd.f32 %v1131_v47, %v1031_v26 }
 0x103   : > { %v360_v50 = vpop.f32.mrf.mxu0 }
 0x104   : > { %v361_v51 = vadd.f32 %v1031_v26, %v360_v50  ;;  %v393_v52 = vpack.c.bf16 %v369_v49, %v366_v46 }
 0x105   : > { %v1134_v53 = vpop.f32.mrf.mxu0 }
 0x106   : > { %v392_v54 = vpack.c.bf16 %v361_v51, %v358_v48  ;;  %v382_v56 = vadd.f32 %v1134_v53, %v1031_v26 }
 0x107   : > { %v373_v55 = vpop.f32.mrf.mxu0 }
 0x108   : > { %1160 = vmatprep.mubr.bf16.mxu1 %v392_v54  ;;  %v374_v58 = vadd.f32 %v1031_v26, %v373_v55 }
 0x109   : > { %v1135_v57 = vpop.f32.mrf.mxu0  ;;  %1161 = vmatmul.mubr.bf16.gmra.mxu1 %v393_v52 }
 0x10a   : > { %v385_v59 = vadd.f32 %v1135_v57, %v1031_v26 }
 0x10b   : > { %v376_v60 = vpop.f32.mrf.mxu0 }
 0x10c   : > { %v377_v61 = vadd.f32 %v1031_v26, %v376_v60  ;;  %v395_v62 = vpack.c.bf16 %v385_v59, %v382_v56  ;;  %v1061_v60 = vld [vmem:[%s1685_s2 + $0x2] ss:$0 sm:$0xff] }
 0x10e   : > { %v394_v63 = vpack.c.bf16 %v377_v61, %v374_v58 }
 0x110   : > { %1164 = vmatprep.mubr.bf16.mxu1 %v394_v63 }
 0x111   : > { %1165 = vmatmul.mubr.bf16.gmra.mxu1 %v395_v62 }
 0x1b9   : > { %v1154_v3 = vpop.f32.mrf.mxu1 }
 0x1ba   : > { %v512_v9 = vadd.f32 %v1154_v3, %v1051_v5 }
 0x1bb   : > { %v503_v4 = vpop.f32.mrf.mxu1 }
 0x1bc   : > { %v504_v7 = vadd.f32 %v1051_v5, %v503_v4  ;;  %v568_v16 = vmax.f32 %v512_v9, 0.0 }
 0x1bd   : > { %v1155_v6 = vpop.f32.mrf.mxu1 }
 0x1be   : > { %v515_v8 = vadd.f32 %v1155_v6, %v1051_v5  ;;  %v566_v14 = vmax.f32 %v504_v7, 0.0 }
 0x1bf   : > { %v506_v10 = vpop.f32.mrf.mxu1 }
 0x1c0   : > { %v507_v11 = vadd.f32 %v1051_v5, %v506_v10  ;;  %v569_v12 = vmax.f32 %v515_v8, 0.0 }
 0x1c1   : > { %v1158_v13 = vpop.f32.mrf.mxu1 }
 0x1c2   : > { %v567_v15 = vmax.f32 %v507_v11, 0.0  ;;  %v583_v19 = vpack.c.bf16 %v569_v12, %v568_v16  ;;  %v528_v23 = vadd.f32 %v1158_v13, %v1051_v5 }
 0x1c3   : > { %v519_v17 = vpop.f32.mrf.mxu1 }
 0x1c4   : > { %v582_v18 = vpack.c.bf16 %v567_v15, %v566_v14  ;;  %v520_v21 = vadd.f32 %v1051_v5, %v519_v17  ;;  %v572_v30 = vmax.f32 %v528_v23, 0.0 }
 0x1c5   : > { %v1159_v20 = vpop.f32.mrf.mxu1 }
 0x1c6   : > { %v531_v22 = vadd.f32 %v1159_v20, %v1051_v5  ;;  %1184 = vmatprep.mubr.bf16.mxu0 %v582_v18  ;;  %v570_v28 = vmax.f32 %v520_v21, 0.0 }
 0x1c7   : > { %v522_v24 = vpop.f32.mrf.mxu1  ;;  %1185 = vmatmul.mubr.bf16.vlgmr.msra.gmra.mxu0 %v583_v19 }
 0x1c8   : > { %v523_v25 = vadd.f32 %v1051_v5, %v522_v24  ;;  %v573_v26 = vmax.f32 %v531_v22, 0.0 }
 0x1c9   : > { %v1162_v27 = vpop.f32.mrf.mxu1 }
 0x1ca   : > { %v571_v29 = vmax.f32 %v523_v25, 0.0  ;;  %v585_v33 = vpack.c.bf16 %v573_v26, %v572_v30  ;;  %v544_v34 = vadd.f32 %v1162_v27, %v1051_v5 }
 0x1cb   : > { %v535_v31 = vpop.f32.mrf.mxu1 }
 0x1cc   : > { %v584_v32 = vpack.c.bf16 %v571_v29, %v570_v28  ;;  %v536_v36 = vadd.f32 %v1051_v5, %v535_v31  ;;  %v576_v40 = vmax.f32 %v544_v34, 0.0 }
 0x1cd   : > { %v1163_v35 = vpop.f32.mrf.mxu1 }
 0x1ce   : > { %v547_v37 = vadd.f32 %v1163_v35, %v1051_v5  ;;  %1188 = vmatprep.mubr.bf16.mxu0 %v584_v32  ;;  %v574_v43 = vmax.f32 %v536_v36, 0.0 }
 0x1cf   : > { %v538_v38 = vpop.f32.mrf.mxu1  ;;  %1189 = vmatmul.mubr.bf16.gmra.mxu0 %v585_v33 }
 0x1d0   : > { %v539_v39 = vadd.f32 %v1051_v5, %v538_v38  ;;  %v577_v41 = vmax.f32 %v547_v37, 0.0 }
 0x1d1   : > { %v1166_v42 = vpop.f32.mrf.mxu1 }
 0x1d2   : > { %v575_v44 = vmax.f32 %v539_v39, 0.0  ;;  %v560_v45 = vadd.f32 %v1166_v42, %v1051_v5  ;;  %v587_v49 = vpack.c.bf16 %v577_v41, %v576_v40 }
 0x1d3   : > { %v551_v46 = vpop.f32.mrf.mxu1 }
 0x1d4   : > { %v586_v47 = vpack.c.bf16 %v575_v44, %v574_v43  ;;  %v552_v48 = vadd.f32 %v1051_v5, %v551_v46  ;;  %v580_v52 = vmax.f32 %v560_v45, 0.0 }
 0x1d5   : > { %v1167_v50 = vpop.f32.mrf.mxu1 }
 0x1d6   : > { %v563_v51 = vadd.f32 %v1167_v50, %v1051_v5  ;;  %1192 = vmatprep.mubr.bf16.mxu0 %v586_v47  ;;  %v578_v54 = vmax.f32 %v552_v48, 0.0 }
 0x1d7   : > { %v554_v53 = vpop.f32.mrf.mxu1  ;;  %1193 = vmatmul.mubr.bf16.gmra.mxu0 %v587_v49 }
 0x1d8   : > { %v581_v55 = vmax.f32 %v563_v51, 0.0  ;;  %v555_v56 = vadd.f32 %v1051_v5, %v554_v53 }
 0x1da   : > { %v579_v57 = vmax.f32 %v555_v56, 0.0  ;;  %v589_v58 = vpack.c.bf16 %v581_v55, %v580_v52 }
 0x1dc   : > { %v588_v59 = vpack.c.bf16 %v579_v57, %v578_v54 }
 0x1de   : > { %1196 = vmatprep.mubr.bf16.mxu0 %v588_v59 }
 0x1df   : > { %1197 = vmatmul.mubr.bf16.gmra.mxu0 %v589_v58 }
 0x287   : > { %v1186_v61 = vpop.f32.mrf.mxu0 }
 0x288   : > { %v706_v62 = vadd.f32 %v1186_v61, %v1061_v60 }
 0x289   : > { %v697_v63 = vpop.f32.mrf.mxu0 }
 0x28a   : > { %v698_v0 = vadd.f32 %v1061_v60, %v697_v63  ;;  %764 = vmax.xlane.f32.xlu1 %v706_v62 }
 0x28b   : > { %v1187_v1 = vpop.f32.mrf.mxu0 }
 0x28c   : > { %v709_v2 = vadd.f32 %v1187_v1, %v1061_v60  ;;  %760 = vmax.xlane.f32.xlu0 %v698_v0 }
 0x28d   : > { %v700_v3 = vpop.f32.mrf.mxu0 }
 0x28e   : > { %v701_v4 = vadd.f32 %v1061_v60, %v700_v3  ;;  %766 = vmax.xlane.f32.xlu1 %v709_v2 }
 0x28f   : > { %v1190_v5 = vpop.f32.mrf.mxu0 }
 0x290   : > { %762 = vmax.xlane.f32.xlu0 %v701_v4  ;;  %v722_v10 = vadd.f32 %v1190_v5, %v1061_v60 }
 0x291   : > { %v713_v6 = vpop.f32.mrf.mxu0 }
 0x292   : > { %v1555_v7 = vadd.f32 %v1061_v60, %v713_v6 }
 0x293   : > { %v1191_v8 = vpop.f32.mrf.mxu0 }
 0x294   : > { %768 = vmax.xlane.f32.xlu0 %v1555_v7  ;;  %v725_v14 = vadd.f32 %v1191_v8, %v1061_v60 }
 0x295   : > { %v716_v9 = vpop.f32.mrf.mxu0 }
 0x296   : > { %v717_v11 = vadd.f32 %v1061_v60, %v716_v9 }
 0x297   : > { %v1194_v12 = vpop.f32.mrf.mxu0 }
 0x298   : > { %770 = vmax.xlane.f32.xlu1 %v717_v11  ;;  %772 = vmax.xlane.f32.xlu0 %v722_v10  ;;  %v738_v18 = vadd.f32 %v1194_v12, %v1061_v60 }
 0x299   : > { %v729_v13 = vpop.f32.mrf.mxu0 }
 0x29a   : > { %v1558_v15 = vadd.f32 %v1061_v60, %v729_v13 }
 0x29b   : > { %v1195_v16 = vpop.f32.mrf.mxu0 }
 0x29c   : > { %774 = vmax.xlane.f32.xlu1 %v725_v14  ;;  %776 = vmax.xlane.f32.xlu0 %v1558_v15  ;;  %v1561_v22 = vadd.f32 %v1195_v16, %v1061_v60 }
 0x29d   : > { %v732_v17 = vpop.f32.mrf.mxu0 }
 0x29e   : > { %v733_v19 = vadd.f32 %v1061_v60, %v732_v17 }
 0x29f   : > { %v1198_v20 = vpop.f32.mrf.mxu0 }
 0x2a0   : > { %778 = vmax.xlane.f32.xlu1 %v733_v19  ;;  %780 = vmax.xlane.f32.xlu0 %v738_v18  ;;  %v1567_v26 = vadd.f32 %v1198_v20, %v1061_v60 }
 0x2a1   : > { %v745_v21 = vpop.f32.mrf.mxu0 }
 0x2a2   : > { %v1563_v23 = vadd.f32 %v1061_v60, %v745_v21 }
 0x2a3   : > { %v1199_v24 = vpop.f32.mrf.mxu0 }
 0x2a4   : > { %782 = vmax.xlane.f32.xlu1 %v1561_v22  ;;  %784 = vmax.xlane.f32.xlu0 %v1563_v23  ;;  %v1573_v28 = vadd.f32 %v1199_v24, %v1061_v60 }
 0x2a5   : > { %v748_v25 = vpop.f32.mrf.mxu0 }
 0x2a6   : > { %v1569_v27 = vadd.f32 %v1061_v60, %v748_v25 }
 0x2a8   : > { %786 = vmax.xlane.f32.xlu1 %v1569_v27  ;;  %788 = vmax.xlane.f32.xlu0 %v1567_v26 }
 0x2ac   : > { %790 = vmax.xlane.f32.xlu1 %v1573_v28 }
 0x313   : > { %v765_v29 = vpop.xlane.xlu1 %764 }
 0x314   : > { %v794_v30 = vsub.f32 %v706_v62, %v765_v29 }
 0x315   : > { %v761_v31 = vpop.xlane.xlu0 %760 }
 0x316   : > { %v812_v32 = vmul.f32 1.442695, %v794_v30  ;;  %v792_v33 = vsub.f32 %v698_v0, %v761_v31 }
 0x317   : > { %v767_v34 = vpop.xlane.xlu1 %766 }
 0x318   : > { %1278 = vpow2.f32 %v812_v32  ;;  %v808_v35 = vmul.f32 1.442695, %v792_v33  ;;  %v795_v37 = vsub.f32 %v709_v2, %v767_v34 }
 0x319   : > { %v763_v36 = vpop.xlane.xlu0 %762 }
 0x31a   : > { %v793_v38 = vsub.f32 %v701_v4, %v763_v36  ;;  %1280 = vpow2.f32 %v808_v35  ;;  %v814_v41 = vmul.f32 1.442695, %v795_v37 }
 0x31c   : > { %v810_v39 = vmul.f32 1.442695, %v793_v38 }
 0x31d   : > { %v769_v40 = vpop.xlane.xlu0 %768 }
 0x31e   : > { %1282 = vpow2.f32 %v810_v39  ;;  %v796_v46 = vsub.f32 %v1555_v7, %v769_v40 }
 0x31f   : > { %1284 = vpow2.f32 %v814_v41 }
 0x320   : > { %v816_v53 = vmul.f32 1.442695, %v796_v46 }
 0x321   : > { %v771_v42 = vpop.xlane.xlu1 %770  ;;  %v773_v43 = vpop.xlane.xlu0 %772 }
 0x322   : > { %v797_v44 = vsub.f32 %v717_v11, %v771_v42  ;;  %v798_v45 = vsub.f32 %v722_v10, %v773_v43 }
 0x324   : > { %v818_v47 = vmul.f32 1.442695, %v797_v44  ;;  %v820_v48 = vmul.f32 1.442695, %v798_v45 }
 0x325   : > { %v1577_v49 = vpop.eup %1278  ;;  %v775_v50 = vpop.xlane.xlu1 %774 }
 0x326   : > { %v777_v51 = vpop.xlane.xlu0 %776  ;;  %1286 = vpow2.f32 %v818_v47  ;;  %v799_v52 = vsub.f32 %v725_v14, %v775_v50  ;;  %844 = vadd.xlane.f32.xlu0 %v1577_v49 }
 0x327   : > { %1288 = vpow2.f32 %v820_v48  ;;  %v1580_v55 = vpop.eup %1280  ;;  %v800_v61 = vsub.f32 %v1558_v15, %v777_v51 }
 0x328   : > { %v822_v54 = vmul.f32 1.442695, %v799_v52 }
 0x329   : > { %v779_v56 = vpop.xlane.xlu1 %778  ;;  %v824_v4 = vmul.f32 1.442695, %v800_v61 }
 0x32a   : > { %v781_v57 = vpop.xlane.xlu0 %780  ;;  %1290 = vpow2.f32 %v822_v54  ;;  %v801_v58 = vsub.f32 %v733_v19, %v779_v56  ;;  %840 = vadd.xlane.f32.xlu0 %v1580_v55 }
 0x32b   : > { %v802_v59 = vsub.f32 %v738_v18, %v781_v57  ;;  %v1583_v60 = vpop.eup %1282  ;;  %1292 = vpow2.f32 %v816_v53 }
 0x32c   : > { %v826_v62 = vmul.f32 1.442695, %v801_v58  ;;  %842 = vadd.xlane.f32.xlu1 %v1583_v60  ;;  %v1588_v3 = vpop.eup %1284 }
 0x32d   : > { %v828_v63 = vmul.f32 1.442695, %v802_v59  ;;  %v783_v0 = vpop.xlane.xlu1 %782 }
 0x32e   : > { %v785_v1 = vpop.xlane.xlu0 %784  ;;  %1294 = vpow2.f32 %v826_v62  ;;  %v803_v2 = vsub.f32 %v1561_v22, %v783_v0 }
 0x32f   : > { %1296 = vpow2.f32 %v828_v63  ;;  %v804_v11 = vsub.f32 %v1563_v23, %v785_v1 }
 0x330   : > { %v830_v5 = vmul.f32 1.442695, %v803_v2  ;;  %846 = vadd.xlane.f32.xlu1 %v1588_v3 }
 0x331   : > { %v787_v6 = vpop.xlane.xlu1 %786  ;;  %v832_v18 = vmul.f32 1.442695, %v804_v11 }
 0x332   : > { %v789_v7 = vpop.xlane.xlu0 %788  ;;  %1298 = vpow2.f32 %v830_v5  ;;  %v805_v8 = vsub.f32 %v1569_v27, %v787_v6 }
 0x333   : > { %v806_v9 = vsub.f32 %v1567_v26, %v789_v7  ;;  %v1593_v10 = vpop.eup %1286  ;;  %1300 = vpow2.f32 %v824_v4 }
 0x334   : > { %v1596_v12 = vpop.eup %1288  ;;  %v834_v13 = vmul.f32 1.442695, %v805_v8  ;;  %850 = vadd.xlane.f32.xlu1 %v1593_v10 }
 0x335   : > { %v836_v14 = vmul.f32 1.442695, %v806_v9  ;;  %852 = vadd.xlane.f32.xlu0 %v1596_v12  ;;  %v791_v15 = vpop.xlane.xlu1 %790 }
 0x336   : > { %1302 = vpow2.f32 %v834_v13  ;;  %v807_v16 = vsub.f32 %v1573_v28, %v791_v15 }
 0x337   : > { %v1601_v17 = vpop.eup %1290  ;;  %1304 = vpow2.f32 %v836_v14 }
 0x338   : > { %v1293_v19 = vpop.eup %1292  ;;  %v838_v20 = vmul.f32 1.442695, %v807_v16  ;;  %854 = vadd.xlane.f32.xlu1 %v1601_v17 }
 0x339   : > { %848 = vadd.xlane.f32.xlu0 %v1293_v19 }
 0x33a   : > { %1306 = vpow2.f32 %v838_v20 }
 0x33b   : > { %v1604_v21 = vpop.eup %1294  ;;  %1308 = vpow2.f32 %v832_v18 }
 0x33c   : > { %v1606_v22 = vpop.eup %1296  ;;  %858 = vadd.xlane.f32.xlu1 %v1604_v21 }
 0x33d   : > { %860 = vadd.xlane.f32.xlu0 %v1606_v22 }
 0x33f   : > { %v1610_v23 = vpop.eup %1298 }
 0x340   : > { %v1612_v24 = vpop.eup %1300  ;;  %862 = vadd.xlane.f32.xlu1 %v1610_v23 }
 0x341   : > { %856 = vadd.xlane.f32.xlu0 %v1612_v24 }
 0x343   : > { %v1616_v25 = vpop.eup %1302 }
 0x344   : > { %v1618_v26 = vpop.eup %1304  ;;  %866 = vadd.xlane.f32.xlu1 %v1616_v25 }
 0x345   : > { %868 = vadd.xlane.f32.xlu0 %v1618_v26 }
 0x347   : > { %v1622_v27 = vpop.eup %1306 }
 0x348   : > { %v1624_v28 = vpop.eup %1308  ;;  %870 = vadd.xlane.f32.xlu1 %v1622_v27 }
 0x349   : > { %864 = vadd.xlane.f32.xlu0 %v1624_v28 }
 0x3af   : > { %v845_v29 = vpop.xlane.xlu0 %844 }
 0x3b3   : > { %v841_v30 = vpop.xlane.xlu0 %840 }
 0x3b4   : > { %1310 = vrcp.f32 %v841_v30 }
 0x3b5   : > { %v843_v31 = vpop.xlane.xlu1 %842 }
 0x3b6   : > { %1312 = vrcp.f32 %v843_v31 }
 0x3b7   : > { %1314 = vrcp.f32 %v845_v29 }
 0x3b9   : > { %v847_v32 = vpop.xlane.xlu1 %846 }
 0x3ba   : > { %1316 = vrcp.f32 %v847_v32 }
 0x3bd   : > { %v851_v38 = vpop.xlane.xlu1 %850 }
 0x3be   : > { %v853_v33 = vpop.xlane.xlu0 %852 }
 0x3c1   : > { %v1311_v34 = vpop.eup %1310  ;;  %v855_v44 = vpop.xlane.xlu1 %854 }
 0x3c2   : > { %v849_v35 = vpop.xlane.xlu0 %848  ;;  %v873_v36 = vmul.f32 %v1311_v34, %v1580_v55 }
 0x3c3   : > { %v1313_v37 = vpop.eup %1312  ;;  %1318 = vrcp.f32 %v849_v35 }
 0x3c4   : > { %904 = vxpose.xlu0.b32.start [1/16] (narrow) %v873_v36, 8  ;;  %1320 = vrcp.f32 %v851_v38  ;;  %v875_v39 = vmul.f32 %v1313_v37, %v1583_v60  ;;  %v1315_v40 = vpop.eup %1314 }
 0x3c5   : > { %1322 = vrcp.f32 %v853_v33  ;;  %v877_v42 = vmul.f32 %v1315_v40, %v1577_v49  ;;  %v859_v51 = vpop.xlane.xlu1 %858 }
 0x3c6   : > { %v861_v41 = vpop.xlane.xlu0 %860  ;;  %1324 = vrcp.f32 %v855_v44 }
 0x3c7   : > { %v1317_v43 = vpop.eup %1316 }
 0x3c8   : > { %905 = vxpose.xlu0.b32.cont [2/16] (narrow) %v875_v39, 8  ;;  %v879_v45 = vmul.f32 %v1317_v43, %v1588_v3 }
 0x3c9   : > { %v863_v56 = vpop.xlane.xlu1 %862 }
 0x3ca   : > { %v857_v46 = vpop.xlane.xlu0 %856 }
 0x3cb   : > { %1326 = vrcp.f32 %v857_v46 }
 0x3cc   : > { %906 = vxpose.xlu0.b32.cont [3/16] (narrow) %v877_v42, 8  ;;  %1328 = vrcp.f32 %v859_v51 }
 0x3cd   : > { %1330 = vrcp.f32 %v861_v41  ;;  %v867_v62 = vpop.xlane.xlu1 %866 }
 0x3ce   : > { %v869_v49 = vpop.xlane.xlu0 %868  ;;  %1332 = vrcp.f32 %v863_v56 }
 0x3d0   : > { %v1319_v47 = vpop.eup %1318  ;;  %907 = vxpose.xlu0.b32.cont [4/16] (narrow) %v879_v45, 8 }
 0x3d1   : > { %v881_v48 = vmul.f32 %v1319_v47, %v1293_v19  ;;  %v1321_v50 = vpop.eup %1320  ;;  %v871_v3 = vpop.xlane.xlu1 %870 }
 0x3d2   : > { %v883_v52 = vmul.f32 %v1321_v50, %v1593_v10  ;;  %v1323_v53 = vpop.eup %1322  ;;  %v865_v59 = vpop.xlane.xlu0 %864 }
 0x3d3   : > { %v885_v54 = vmul.f32 %v1323_v53, %v1596_v12  ;;  %v1325_v55 = vpop.eup %1324  ;;  %1334 = vrcp.f32 %v865_v59 }
 0x3d4   : > { %908 = vxpose.xlu0.b32.cont [5/16] (narrow) %v881_v48, 8  ;;  %v887_v57 = vmul.f32 %v1325_v55, %v1601_v17  ;;  %1336 = vrcp.f32 %v867_v62 }
 0x3d5   : > { %1338 = vrcp.f32 %v869_v49 }
 0x3d6   : > { %1340 = vrcp.f32 %v871_v3 }
 0x3d8   : > { %909 = vxpose.xlu0.b32.cont [6/16] (narrow) %v883_v52, 8  ;;  %v1327_v58 = vpop.eup %1326 }
 0x3d9   : > { %v889_v60 = vmul.f32 %v1327_v58, %v1612_v24  ;;  %v1329_v61 = vpop.eup %1328 }
 0x3da   : > { %v891_v63 = vmul.f32 %v1329_v61, %v1604_v21  ;;  %v1331_v0 = vpop.eup %1330 }
 0x3db   : > { %v893_v1 = vmul.f32 %v1331_v0, %v1606_v22  ;;  %v1333_v2 = vpop.eup %1332 }
 0x3dc   : > { %910 = vxpose.xlu0.b32.cont [7/16] (narrow) %v885_v54, 8  ;;  %v895_v4 = vmul.f32 %v1333_v2, %v1610_v23 }
 0x3e0   : > { %911 = vxpose.xlu0.b32.cont [8/16] (narrow) %v887_v57, 8  ;;  %v1335_v5 = vpop.eup %1334 }
 0x3e1   : > { %v897_v6 = vmul.f32 %v1335_v5, %v1624_v28  ;;  %v1337_v7 = vpop.eup %1336 }
 0x3e2   : > { %v899_v8 = vmul.f32 %v1337_v7, %v1616_v25  ;;  %v1339_v9 = vpop.eup %1338 }
 0x3e3   : > { %v901_v10 = vmul.f32 %v1339_v9, %v1618_v26  ;;  %v1341_v11 = vpop.eup %1340 }
 0x3e4   : > { %912 = vxpose.xlu0.b32.cont [9/16] (narrow) %v889_v60, 8  ;;  %v903_v12 = vmul.f32 %v1341_v11, %v1622_v27 }
 0x3e8   : > { %913 = vxpose.xlu0.b32.cont [10/16] (narrow) %v891_v63, 8 }
 0x3ec   : > { %914 = vxpose.xlu0.b32.cont [11/16] (narrow) %v893_v1, 8 }
 0x3f0   : > { %915 = vxpose.xlu0.b32.cont [12/16] (narrow) %v895_v4, 8 }
 0x3f4   : > { %916 = vxpose.xlu0.b32.cont [13/16] (narrow) %v897_v6, 8 }
 0x3f8   : > { %917 = vxpose.xlu0.b32.cont [14/16] (narrow) %v899_v8, 8 }
 0x3fc   : > { %918 = vxpose.xlu0.b32.cont [15/16] (narrow) %v901_v10, 8 }
 0x400   : > { %919 = vxpose.xlu0.b32.end [16/16] (narrow) %v903_v12, 8 }
 0x440   : > { %v920_v13 = vpop.trf.xlu0 }
 0x441   : > { %936 = vst [vmem:[%s179_s27] sm:$0xf] %v920_v13 }
 0x442   : > { %1381 = shalt.err (!%p1378_p0)
}
 0x443   : > { %s1382_s10 = scalar_lea.hbm %s949_s5, 64  ;;  %s1386_s19 = scalar_lea.hbm %s1686_s3, 128 }
 0x444   : > { %p1383_p1 = scmp.ne.s32.totalorder %s949_s5, %s1382_s10  ;;  %p1387_p4 = scmp.lt.s32.totalorder %s949_s5, %s1686_s3 }
 0x445   : > { %p1388_p7 = scmp.lt.s32.totalorder %s1386_s19, %s1382_s10 }
 0x446   : > { %p1384_p2 = pnand %p1383_p1, %p1496_p5 }
 0x447   : > { %p1389_p8 = por %p1388_p7, %p1387_p4 }
 0x448   : > { %p1385_p3 = pneg %p1384_p2 }
 0x44a   : > { %p1390_p6 = pnand %p1389_p8, %p1385_p3 }
 0x44c   : > { %1393 = shalt.err (!%p1390_p6)
}
 0x44d   : > { %1204 = dma.vmem_to_hbm [thread:$0]  (%p1496_p5), %s1645_s28, 64, %s949_s5, %s938_s6  }
 0x44e PF: > { %p1216_p9 = scmp.ge.s32.totalorder %s1432_s15, 2  ;;  %s963_s25 = sand.u32 1, %s1420_s12  }
 0x44f   : > { %p1690_p10 = scmp.ne.s32.totalorder %s1688_s23, 0  ;;  %s964_s26 = scalar_lea.sflag [#allocation4], %s963_s25 }
 0x451   : > { %p1211_p11 = pnand %p1216_p9, %p1690_p10 }
 0x453   : > { %p1212_p12 = pneg %p1211_p11 }
 0x455   : > { %1415 = dma.done.wait (%p1212_p12), %s964_s26, 64  }
 0x456   : > { %1417 = vsyncadd (%p1212_p12), %s964_s26, 4294967232  ;;  %p14_p13 = scmp.ge.s32.totalorder %s1483_s18, 4   ;;  %s1691_s12 = smov %s1424_s13 }
 0x457   : > { %s1692_s13 = smov %s1428_s14  ;;  %s1693_s14 = smov %s1494_s21 }
 0x458   : > { %s1694_s15 = smov %s1483_s18  ;;  %16 = sbr.rel (!%p14_p13) target bundleno = 4 (0x4), region = 76 }
 0x45d   :  { %969 = vsyncpa [#allocation3], 1 }
 0x45e   :  { %971 = vsyncpa [#allocation3 + $0x1], 1 }
 0x45f   :  { %972 = vsyncpa [#allocation4], 1 }
 0x460   :  { %974 = vsyncpa [#allocation4 + $0x1], 1 }

</bundles_post_ra>
